<compile_context>
chip_gen: v5e
topology: v5e:2x2
jax: 0.10.0
libtpu: 0.0.40
codegen_flags: <defaults>
</compile_context>

<pallas_src>
import functools

import jax
import jax.numpy as jnp
from jax.experimental import pallas as pl
from jax.experimental.pallas import tpu as pltpu


# -----------------------------------------------------------------------------
# Fused Pallas kernel: one grid step per mask, full batch per step.
# -----------------------------------------------------------------------------
def _fused_predictor_kernel(
        zi_ref, li_ref, hi_ref,          # [1,B,Nc,D], [1,B,L,D], [1,B,Nt,D] f32
        mc_ref, mt_ref,                  # [1,B*Nc,1], [1,B*Nt,1] int32
        pos_ref, mtok_ref,               # [P,D] f32, [1,1,D] f32 (mask token k)
        wq_ref, wk_ref, wv_ref, wo_ref,  # [D,D] bf16 (wq pre-scaled by 1/sqrt(D))
        w1_ref, b1_ref, w2_ref, b2_ref,  # [D,H] bf16, [1,H] f32, [H,D] bf16, [1,D] f32
        wp_ref,                          # [D,D] bf16
        o_ref,                           # [1,B*Nt,D] f32
        ctx_scr):                        # VMEM scratch [B,S,D] f32
    _, B, Nc, D = zi_ref.shape
    L = li_ref.shape[2]
    Nt = hi_ref.shape[2]
    P = pos_ref.shape[0]
    S = Nc + L
    f32, bf16 = jnp.float32, jnp.bfloat16

    pos = pos_ref[...]                                       # (P, D) f32

    # --- fused positional-embedding gather: exact one-hot matmul on the MXU --
    def gather_pos(idx_ref, n):
        idx = idx_ref[0]                                     # (n, 1) int32
        hot = jax.lax.broadcasted_iota(jnp.int32, (n, P), 1) == idx
        return jnp.dot(hot.astype(f32), pos, preferred_element_type=f32)

    pos_c = gather_pos(mc_ref, B * Nc)                       # (B*Nc, D)
    pos_t = gather_pos(mt_ref, B * Nt)                       # (B*Nt, D)

    # --- query tokens: hi + pos_tgt + mask_token[k] (k == grid index) --------
    q = hi_ref[0].reshape(B * Nt, D) + pos_t + mtok_ref[0]   # (B*Nt, D) f32

    # --- context tokens assembled in VMEM: [zi + pos_ctxt | li] --------------
    ctx_scr[:, 0:Nc, :] = zi_ref[0] + pos_c.reshape(B, Nc, D)
    ctx_scr[:, Nc:S, :] = li_ref[0]
    ctx = ctx_scr[...].reshape(B * S, D)                     # (B*S, D) f32

    # --- single-head cross attention (bf16 MXU operands, f32 accumulation) ---
    qh = jnp.dot(q.astype(bf16), wq_ref[...],
                 preferred_element_type=f32).reshape(B, Nt, D)
    kh = jnp.dot(ctx.astype(bf16), wk_ref[...],
                 preferred_element_type=f32).reshape(B, S, D)
    vh = jnp.dot(ctx.astype(bf16), wv_ref[...],
                 preferred_element_type=f32).reshape(B, S, D)

    s = jnp.einsum('bqd,bkd->bqk', qh.astype(bf16), kh.astype(bf16),
                   preferred_element_type=f32)               # (B, Nt, S)
    s = s - jnp.max(s, axis=-1, keepdims=True)
    p = jnp.exp(s)
    p = p * pl.reciprocal(jnp.sum(p, axis=-1, keepdims=True), approx=True)

    attn = jnp.einsum('bqk,bkd->bqd', p.astype(bf16), vh.astype(bf16),
                      preferred_element_type=f32).reshape(B * Nt, D)
    x = q + jnp.dot(attn.astype(bf16), wo_ref[...], preferred_element_type=f32)

    # --- residual MLP (tanh-GELU == nn.GELU(approximate='tanh')) -------------
    h = jnp.dot(x.astype(bf16), w1_ref[...],
                preferred_element_type=f32) + b1_ref[...]
    h = jax.nn.gelu(h, approximate=True)
    x = x + jnp.dot(h.astype(bf16), w2_ref[...],
                    preferred_element_type=f32) + b2_ref[...]

    # --- prediction head ------------------------------------------------------
    o_ref[0] = jnp.dot(x.astype(bf16), wp_ref[...],
                       preferred_element_type=f32).astype(o_ref.dtype)


# -----------------------------------------------------------------------------
# Fused multi-mask backbone: one pallas_call for all masks + whole batch.
# -----------------------------------------------------------------------------
@jax.jit
def multimask_backbone_forward(params, zi, li, hi, mc, mt):
    """zi:[K,B,Nc,D]  li:[K,B,L,D]  hi:[K,B,Nt,D]  mc:[K,B,Nc] mt:[K,B,Nt] int32
    Returns predictions [K,B,Nt,D]; mask k uses params['mask_tokens'][k]."""
    K, B, Nc, D = zi.shape
    L = li.shape[2]
    Nt = hi.shape[2]
    S = Nc + L

    # Index columns for the in-kernel one-hot gather (free XLA reshapes).
    mc_col = mc.reshape(K, B * Nc, 1).astype(jnp.int32)
    mt_col = mt.reshape(K, B * Nt, 1).astype(jnp.int32)
    mtok = params["mask_tokens"][:K][:, None, :]             # [K,1,D]

    def per_mask(shape):
        nd = len(shape)
        return pl.BlockSpec((1,) + tuple(shape[1:]),
                            lambda k: (k,) + (0,) * (nd - 1))

    def shared(shape):
        nd = len(shape)
        return pl.BlockSpec(tuple(shape), lambda k: (0,) * nd)

    out = pl.pallas_call(
        _fused_predictor_kernel,
        out_shape=jax.ShapeDtypeStruct((K, B * Nt, D), zi.dtype),
        grid_spec=pltpu.PrefetchScalarGridSpec(
            num_scalar_prefetch=0,
            grid=(K,),                       # one fat step per mask; weights
                                             # stay VMEM-resident across steps
            in_specs=[
                per_mask(zi.shape), per_mask(li.shape), per_mask(hi.shape),
                per_mask(mc_col.shape), per_mask(mt_col.shape),
                shared(params["pos_emb"].shape),
                per_mask(mtok.shape),
                shared(params["wq"].shape), shared(params["wk"].shape),
                shared(params["wv"].shape), shared(params["wo"].shape),
                shared(params["w1"].shape), shared(params["b1"].shape),
                shared(params["w2"].shape), shared(params["b2"].shape),
                shared(params["wp"].shape),
            ],
            out_specs=pl.BlockSpec((1, B * Nt, D), lambda k: (k, 0, 0)),
            scratch_shapes=[pltpu.VMEM((B, S, D), jnp.float32)],
        ),
        compiler_params=pltpu.CompilerParams(
            dimension_semantics=("parallel",)),   # mask axis -> megacore on v7x
    )(zi, li, hi, mc_col, mt_col,
      params["pos_emb"], mtok,
      params["wq"], params["wk"], params["wv"], params["wo"],
      params["w1"], params["b1"], params["w2"], params["b2"],
      params["wp"])

    return out.reshape(K, B, Nt, D)                          # free reshape


# -----------------------------------------------------------------------------
# Synthetic backbone parameters.
# -----------------------------------------------------------------------------
def make_backbone_params(key, dim=32, hidden=64, num_pos=64, num_masks=4):
    ks = jax.random.split(key, 9)
    s = 0.02
    bf16 = jnp.bfloat16
    scale = dim ** -0.5     # 1/sqrt(D) attention scale folded into wq (perf)
    return {
        "pos_emb":     s * jax.random.normal(ks[0], (num_pos, dim), jnp.float32),
        "mask_tokens": s * jax.random.normal(ks[1], (num_masks, dim), jnp.float32),
        # Matmul weights stored in bf16 (MXU-native on v6e/v7x); the kernel
        # requests f32 accumulation. Biases / embeddings stay f32.
        "wq": (s * scale * jax.random.normal(ks[2], (dim, dim), jnp.float32)).astype(bf16),
        "wk": (s * jax.random.normal(ks[3], (dim, dim), jnp.float32)).astype(bf16),
        "wv": (s * jax.random.normal(ks[4], (dim, dim), jnp.float32)).astype(bf16),
        "wo": (s * jax.random.normal(ks[5], (dim, dim), jnp.float32)).astype(bf16),
        "w1": (s * jax.random.normal(ks[6], (dim, hidden), jnp.float32)).astype(bf16),
        "b1": jnp.zeros((1, hidden), jnp.float32),
        "w2": (s * jax.random.normal(ks[7], (hidden, dim), jnp.float32)).astype(bf16),
        "b2": jnp.zeros((1, dim), jnp.float32),
        "wp": (s * jax.random.normal(ks[8], (dim, dim), jnp.float32)).astype(bf16),
    }


# -----------------------------------------------------------------------------
# The multimask wrapper (forward semantics of the PyTorch module preserved).
# -----------------------------------------------------------------------------
class SLTPredictorMultiMaskWrapper:
    """outs[k] == backbone applied to the k-th mask's inputs with mask_index=k.
    The per-mask Python loop of the reference is collapsed into a single fused
    backbone call over a stacked leading mask axis (one Pallas launch)."""

    def __init__(self, backbone):
        self._backbone = backbone

    def __call__(self, img_ctxt, lang_ctxt, mask_tgt,
                 masks_ctxt_indices, masks_tgt_indices):
        if not isinstance(img_ctxt, list):
            img_ctxt = [img_ctxt]
        if not isinstance(lang_ctxt, list):
            lang_ctxt = [lang_ctxt]
        if not isinstance(mask_tgt, list):
            masks_tgt = [mask_tgt]
        else:
            masks_tgt = mask_tgt
        if not isinstance(masks_ctxt_indices, list):
            masks_ctxt_indices = [masks_ctxt_indices]
        if not isinstance(masks_tgt_indices, list):
            masks_tgt_indices = [masks_tgt_indices]
        # zip (shortest wins) mirrors the reference loop's behaviour.
        packed = list(zip(img_ctxt, lang_ctxt, masks_tgt,
                          masks_ctxt_indices, masks_tgt_indices))
        zi = jnp.stack([p[0] for p in packed])
        li = jnp.stack([p[1] for p in packed])
        hi = jnp.stack([p[2] for p in packed])
        mc = jnp.stack([p[3] for p in packed])
        mt = jnp.stack([p[4] for p in packed])
        out = self._backbone(zi, li, hi, mc, mt)   # [K,B,Nt,D] — one launch
        return [out[k] for k in range(len(packed))]


# -----------------------------------------------------------------------------
# Pure-JAX reference of the single-mask backbone (same bf16 casts as the kernel).
# -----------------------------------------------------------------------------
def _reference_single_mask(params, zi, li, hi, mc, mt, mask_index):
    f32, bf16 = jnp.float32, jnp.bfloat16
    pos_c = jnp.take(params["pos_emb"], mc, axis=0)          # [B,Nc,D]
    pos_t = jnp.take(params["pos_emb"], mt, axis=0)          # [B,Nt,D]
    q = hi + pos_t + params["mask_tokens"][mask_index][None, None, :]
    ctx = jnp.concatenate([zi + pos_c, li], axis=1)          # [B,S,D]
    qh = jnp.einsum('bnd,de->bne', q.astype(bf16), params["wq"],
                    preferred_element_type=f32)
    kh = jnp.einsum('bnd,de->bne', ctx.astype(bf16), params["wk"],
                    preferred_element_type=f32)
    vh = jnp.einsum('bnd,de->bne', ctx.astype(bf16), params["wv"],
                    preferred_element_type=f32)
    s = jnp.einsum('bqd,bkd->bqk', qh.astype(bf16), kh.astype(bf16),
                   preferred_element_type=f32)
    p = jax.nn.softmax(s, axis=-1)
    attn = jnp.einsum('bqk,bkd->bqd', p.astype(bf16), vh.astype(bf16),
                      preferred_element_type=f32)
    x = q + jnp.einsum('bnd,de->bne', attn.astype(bf16), params["wo"],
                       preferred_element_type=f32)
    h = jnp.einsum('bnd,dh->bnh', x.astype(bf16), params["w1"],
                   preferred_element_type=f32) + params["b1"]
    h = jax.nn.gelu(h, approximate=True)
    x = x + jnp.einsum('bnh,hd->bnd', h.astype(bf16), params["w2"],
                       preferred_element_type=f32) + params["b2"]
    return jnp.einsum('bnd,de->bne', x.astype(bf16), params["wp"],
                      preferred_element_type=f32)


# -----------------------------------------------------------------------------
# Demo
# -----------------------------------------------------------------------------
if __name__ == "__main__":
    B, Nc, L, Nt, D = 2, 16, 8, 8, 32
    NUM_POS, NUM_MASKS = 64, 4

    key = jax.random.PRNGKey(0)
    kp, *ks = jax.random.split(key, 12)
    params = make_backbone_params(kp, dim=D, hidden=64,
                                  num_pos=NUM_POS, num_masks=NUM_MASKS)
    backbone = functools.partial(multimask_backbone_forward, params)
    model = SLTPredictorMultiMaskWrapper(backbone)

    def tok(k, n):
        return jax.random.normal(k, (B, n, D), jnp.float32)

    # Two masks -> lists of length 2 (exercises the list-normalization path).
    img_ctxt = [tok(ks[0], Nc), tok(ks[1], Nc)]
    lang_ctxt = [tok(ks[2], L), tok(ks[3], L)]
    mask_tgt = [tok(ks[4], Nt), tok(ks[5], Nt)]
    masks_ctxt_indices = [
        jax.random.randint(ks[6], (B, Nc), 0, NUM_POS, jnp.int32),
        jax.random.randint(ks[7], (B, Nc), 0, NUM_POS, jnp.int32),
    ]
    masks_tgt_indices = [
        jax.random.randint(ks[8], (B, Nt), 0, NUM_POS, jnp.int32),
        jax.random.randint(ks[9], (B, Nt), 0, NUM_POS, jnp.int32),
    ]

    outs = model(img_ctxt, lang_ctxt, mask_tgt,
                 masks_ctxt_indices, masks_tgt_indices)
    for o in outs:
        jax.block_until_ready(o)

    assert len(outs) == 2
    assert all(o.shape == (B, Nt, D) for o in outs)
    assert all(bool(jnp.all(jnp.isfinite(o))) for o in outs)

    # Per-mask pure-JAX reference (the original loop semantics).
    refs = [_reference_single_mask(params, img_ctxt[k], lang_ctxt[k],
                                   mask_tgt[k], masks_ctxt_indices[k],
                                   masks_tgt_indices[k], k)
            for k in range(2)]
    max_err = max(float(jnp.max(jnp.abs(o - r))) for o, r in zip(outs, refs))
    assert max_err < 1e-2, f"mismatch vs reference: {max_err}"

    print("KERNEL_OK")
</pallas_src>

<mosaic_0001>
module attributes {stable_mosaic.version = 11 : i64} {
  func.func @_fused_predictor_kernel(%arg0: i32, %arg1: memref<1x2x16x32xf32, #tpu.memory_space<vmem>>, %arg2: memref<1x2x8x32xf32, #tpu.memory_space<vmem>>, %arg3: memref<1x2x8x32xf32, #tpu.memory_space<vmem>>, %arg4: memref<1x32x1xi32, #tpu.memory_space<vmem>>, %arg5: memref<1x16x1xi32, #tpu.memory_space<vmem>>, %arg6: memref<64x32xf32, #tpu.memory_space<vmem>>, %arg7: memref<1x1x32xf32, #tpu.memory_space<vmem>>, %arg8: memref<32x32xbf16, #tpu.memory_space<vmem>>, %arg9: memref<32x32xbf16, #tpu.memory_space<vmem>>, %arg10: memref<32x32xbf16, #tpu.memory_space<vmem>>, %arg11: memref<32x32xbf16, #tpu.memory_space<vmem>>, %arg12: memref<32x64xbf16, #tpu.memory_space<vmem>>, %arg13: memref<1x64xf32, #tpu.memory_space<vmem>>, %arg14: memref<64x32xbf16, #tpu.memory_space<vmem>>, %arg15: memref<1x32xf32, #tpu.memory_space<vmem>>, %arg16: memref<32x32xbf16, #tpu.memory_space<vmem>>, %arg17: memref<1x16x32xf32, #tpu.memory_space<vmem>>, %arg18: memref<2x24x32xf32, #tpu.memory_space<vmem>>) attributes {dimension_semantics = [#tpu.dimension_semantics<parallel>], iteration_bounds = array<i64: 2>, scalar_prefetch = 0 : i64, scratch_operands = 1 : i64, tpu.core_type = #tpu.core_type<tc>, window_params = [{transform_indices = @transform_0, window_bounds = array<i64: 1, 2, 16, 32>}, {transform_indices = @transform_1, window_bounds = array<i64: 1, 2, 8, 32>}, {transform_indices = @transform_2, window_bounds = array<i64: 1, 2, 8, 32>}, {transform_indices = @transform_3, window_bounds = array<i64: 1, 32, 1>}, {transform_indices = @transform_4, window_bounds = array<i64: 1, 16, 1>}, {pipeline_mode = #tpu.pipeline_mode<synchronous>, transform_indices = @transform_5, window_bounds = array<i64: 64, 32>}, {transform_indices = @transform_6, window_bounds = array<i64: 1, 1, 32>}, {pipeline_mode = #tpu.pipeline_mode<synchronous>, transform_indices = @transform_7, window_bounds = array<i64: 32, 32>}, {pipeline_mode = #tpu.pipeline_mode<synchronous>, transform_indices = @transform_8, window_bounds = array<i64: 32, 32>}, {pipeline_mode = #tpu.pipeline_mode<synchronous>, transform_indices = @transform_9, window_bounds = array<i64: 32, 32>}, {pipeline_mode = #tpu.pipeline_mode<synchronous>, transform_indices = @transform_10, window_bounds = array<i64: 32, 32>}, {pipeline_mode = #tpu.pipeline_mode<synchronous>, transform_indices = @transform_11, window_bounds = array<i64: 32, 64>}, {pipeline_mode = #tpu.pipeline_mode<synchronous>, transform_indices = @transform_12, window_bounds = array<i64: 1, 64>}, {pipeline_mode = #tpu.pipeline_mode<synchronous>, transform_indices = @transform_13, window_bounds = array<i64: 64, 32>}, {pipeline_mode = #tpu.pipeline_mode<synchronous>, transform_indices = @transform_14, window_bounds = array<i64: 1, 32>}, {pipeline_mode = #tpu.pipeline_mode<synchronous>, transform_indices = @transform_15, window_bounds = array<i64: 32, 32>}, {transform_indices = @transform_16, window_bounds = array<i64: 1, 16, 32>}]} {
    %c0 = arith.constant 0 : index
    %c0_0 = arith.constant 0 : index
    %0 = vector.load %arg6[%c0, %c0_0] : memref<64x32xf32, #tpu.memory_space<vmem>>, vector<64x32xf32>
    %c0_1 = arith.constant 0 : index
    %c0_2 = arith.constant 0 : index
    %c0_3 = arith.constant 0 : index
    %1 = vector.load %arg4[%c0_1, %c0_2, %c0_3] : memref<1x32x1xi32, #tpu.memory_space<vmem>>, vector<1x32x1xi32>
    %2 = vector.shape_cast %1 : vector<1x32x1xi32> to vector<32x1xi32>
    %3 = tpu.iota {dimensions = array<i32: 1>} : vector<32x64xi32>
    %4 = vector.broadcast %2 : vector<32x1xi32> to vector<32x64xi32>
    %5 = arith.cmpi eq, %3, %4 : vector<32x64xi32>
    %6 = arith.extui %5 : vector<32x64xi1> to vector<32x64xi32>
    %7 = arith.sitofp %6 : vector<32x64xi32> to vector<32x64xf32>
    %cst = arith.constant dense<0.000000e+00> : vector<32x32xf32>
    %8 = tpu.matmul %7, %0, %cst {dimension_numbers = #tpu.dot_dimension_numbers<[1], [0], [0], [1], [0, 0, 1, 1], [], []>} : vector<32x64xf32>, vector<64x32xf32>, vector<32x32xf32> -> vector<32x32xf32>
    %c0_4 = arith.constant 0 : index
    %c0_5 = arith.constant 0 : index
    %c0_6 = arith.constant 0 : index
    %9 = vector.load %arg5[%c0_4, %c0_5, %c0_6] : memref<1x16x1xi32, #tpu.memory_space<vmem>>, vector<1x16x1xi32>
    %10 = vector.shape_cast %9 : vector<1x16x1xi32> to vector<16x1xi32>
    %11 = tpu.iota {dimensions = array<i32: 1>} : vector<16x64xi32>
    %12 = vector.broadcast %10 : vector<16x1xi32> to vector<16x64xi32>
    %13 = arith.cmpi eq, %11, %12 : vector<16x64xi32>
    %14 = arith.extui %13 : vector<16x64xi1> to vector<16x64xi32>
    %15 = arith.sitofp %14 : vector<16x64xi32> to vector<16x64xf32>
    %cst_7 = arith.constant dense<0.000000e+00> : vector<16x32xf32>
    %16 = tpu.matmul %15, %0, %cst_7 {dimension_numbers = #tpu.dot_dimension_numbers<[1], [0], [0], [1], [0, 0, 1, 1], [], []>} : vector<16x64xf32>, vector<64x32xf32>, vector<16x32xf32> -> vector<16x32xf32>
    %c0_8 = arith.constant 0 : index
    %c0_9 = arith.constant 0 : index
    %c0_10 = arith.constant 0 : index
    %c0_11 = arith.constant 0 : index
    %17 = vector.load %arg3[%c0_8, %c0_9, %c0_10, %c0_11] : memref<1x2x8x32xf32, #tpu.memory_space<vmem>>, vector<1x2x8x32xf32>
    %18 = vector.shape_cast %17 : vector<1x2x8x32xf32> to vector<2x8x32xf32>
    %19 = vector.shape_cast %18 : vector<2x8x32xf32> to vector<16x32xf32>
    %20 = arith.addf %19, %16 : vector<16x32xf32>
    %c0_12 = arith.constant 0 : index
    %c0_13 = arith.constant 0 : index
    %c0_14 = arith.constant 0 : index
    %21 = vector.load %arg7[%c0_12, %c0_13, %c0_14] : memref<1x1x32xf32, #tpu.memory_space<vmem>>, vector<1x1x32xf32>
    %22 = vector.shape_cast %21 : vector<1x1x32xf32> to vector<1x32xf32>
    %23 = vector.broadcast %22 : vector<1x32xf32> to vector<16x32xf32>
    %24 = arith.addf %20, %23 : vector<16x32xf32>
    %c0_15 = arith.constant 0 : index
    %c0_16 = arith.constant 0 : index
    %c0_17 = arith.constant 0 : index
    %c0_18 = arith.constant 0 : index
    %25 = vector.load %arg1[%c0_15, %c0_16, %c0_17, %c0_18] : memref<1x2x16x32xf32, #tpu.memory_space<vmem>>, vector<1x2x16x32xf32>
    %26 = vector.shape_cast %25 : vector<1x2x16x32xf32> to vector<2x16x32xf32>
    %27 = vector.shape_cast %8 : vector<32x32xf32> to vector<2x16x32xf32>
    %28 = arith.addf %26, %27 : vector<2x16x32xf32>
    %c0_19 = arith.constant 0 : index
    %c0_20 = arith.constant 0 : index
    %c0_21 = arith.constant 0 : index
    %29 = vector.load %arg18[%c0_19, %c0_20, %c0_21] : memref<2x24x32xf32, #tpu.memory_space<vmem>>, vector<2x16x32xf32>
    tpu.vector_store %arg18[%c0_19, %c0_20, %c0_21], %28 {strides = array<i32>} : memref<2x24x32xf32, #tpu.memory_space<vmem>>, vector<2x16x32xf32>,
    %c0_22 = arith.constant 0 : index
    %c0_23 = arith.constant 0 : index
    %c0_24 = arith.constant 0 : index
    %c0_25 = arith.constant 0 : index
    %30 = vector.load %arg2[%c0_22, %c0_23, %c0_24, %c0_25] : memref<1x2x8x32xf32, #tpu.memory_space<vmem>>, vector<1x2x8x32xf32>
    %31 = vector.shape_cast %30 : vector<1x2x8x32xf32> to vector<2x8x32xf32>
    %c0_26 = arith.constant 0 : index
    %c16 = arith.constant 16 : index
    %c0_27 = arith.constant 0 : index
    %32 = vector.load %arg18[%c0_26, %c16, %c0_27] : memref<2x24x32xf32, #tpu.memory_space<vmem>>, vector<2x8x32xf32>
    tpu.vector_store %arg18[%c0_26, %c16, %c0_27], %31 {strides = array<i32>} : memref<2x24x32xf32, #tpu.memory_space<vmem>>, vector<2x8x32xf32>,
    %c0_28 = arith.constant 0 : index
    %c0_29 = arith.constant 0 : index
    %c0_30 = arith.constant 0 : index
    %33 = vector.load %arg18[%c0_28, %c0_29, %c0_30] : memref<2x24x32xf32, #tpu.memory_space<vmem>>, vector<2x24x32xf32>
    %34 = vector.shape_cast %33 : vector<2x24x32xf32> to vector<48x32xf32>
    %35 = arith.truncf %24 : vector<16x32xf32> to vector<16x32xbf16>
    %c0_31 = arith.constant 0 : index
    %c0_32 = arith.constant 0 : index
    %36 = vector.load %arg8[%c0_31, %c0_32] : memref<32x32xbf16, #tpu.memory_space<vmem>>, vector<32x32xbf16>
    %cst_33 = arith.constant dense<0.000000e+00> : vector<16x32xf32>
    %37 = tpu.matmul %35, %36, %cst_33 {dimension_numbers = #tpu.dot_dimension_numbers<[1], [0], [0], [1], [0, 0, 1, 1], [], []>} : vector<16x32xbf16>, vector<32x32xbf16>, vector<16x32xf32> -> vector<16x32xf32>
    %38 = vector.shape_cast %37 : vector<16x32xf32> to vector<2x8x32xf32>
    %39 = arith.truncf %34 : vector<48x32xf32> to vector<48x32xbf16>
    %c0_34 = arith.constant 0 : index
    %c0_35 = arith.constant 0 : index
    %40 = vector.load %arg9[%c0_34, %c0_35] : memref<32x32xbf16, #tpu.memory_space<vmem>>, vector<32x32xbf16>
    %cst_36 = arith.constant dense<0.000000e+00> : vector<48x32xf32>
    %41 = tpu.matmul %39, %40, %cst_36 {dimension_numbers = #tpu.dot_dimension_numbers<[1], [0], [0], [1], [0, 0, 1, 1], [], []>} : vector<48x32xbf16>, vector<32x32xbf16>, vector<48x32xf32> -> vector<48x32xf32>
    %42 = vector.shape_cast %41 : vector<48x32xf32> to vector<2x24x32xf32>
    %43 = arith.truncf %34 : vector<48x32xf32> to vector<48x32xbf16>
    %c0_37 = arith.constant 0 : index
    %c0_38 = arith.constant 0 : index
    %44 = vector.load %arg10[%c0_37, %c0_38] : memref<32x32xbf16, #tpu.memory_space<vmem>>, vector<32x32xbf16>
    %cst_39 = arith.constant dense<0.000000e+00> : vector<48x32xf32>
    %45 = tpu.matmul %43, %44, %cst_39 {dimension_numbers = #tpu.dot_dimension_numbers<[1], [0], [0], [1], [0, 0, 1, 1], [], []>} : vector<48x32xbf16>, vector<32x32xbf16>, vector<48x32xf32> -> vector<48x32xf32>
    %46 = vector.shape_cast %45 : vector<48x32xf32> to vector<2x24x32xf32>
    %47 = arith.truncf %38 : vector<2x8x32xf32> to vector<2x8x32xbf16>
    %48 = arith.truncf %42 : vector<2x24x32xf32> to vector<2x24x32xbf16>
    "tpu.trace_start"() <{level = 10 : i32, message = "bqd,bkd->bqk"}> : () -> ()
    %cst_40 = arith.constant dense<0.000000e+00> : vector<2x8x24xf32>
    %49 = tpu.matmul %47, %48, %cst_40 {dimension_numbers = #tpu.dot_dimension_numbers<[2], [2], [1], [1], [0, 0, 0, 1, 1, 1], [0], [0]>} : vector<2x8x32xbf16>, vector<2x24x32xbf16>, vector<2x8x24xf32> -> vector<2x8x24xf32>
    "tpu.trace_stop"() : () -> ()
    %cst_41 = arith.constant dense<0xFF800000> : vector<2x8xf32>
    %50 = vector.multi_reduction <maximumf>, %49, %cst_41 [2] : vector<2x8x24xf32> to vector<2x8xf32>
    %51 = vector.shape_cast %50 : vector<2x8xf32> to vector<2x8x1xf32>
    %52 = vector.broadcast %51 : vector<2x8x1xf32> to vector<2x8x24xf32>
    %53 = arith.subf %49, %52 : vector<2x8x24xf32>
    %54 = math.exp %53 : vector<2x8x24xf32>
    %cst_42 = arith.constant dense<0.000000e+00> : vector<2x8xf32>
    %55 = vector.multi_reduction <add>, %54, %cst_42 [2] : vector<2x8x24xf32> to vector<2x8xf32>
    %56 = vector.shape_cast %55 : vector<2x8xf32> to vector<2x8x1xf32>
    %57 = tpu.reciprocal %56 {approx = true} : vector<2x8x1xf32> -> vector<2x8x1xf32>
    %58 = vector.broadcast %57 : vector<2x8x1xf32> to vector<2x8x24xf32>
    %59 = arith.mulf %54, %58 : vector<2x8x24xf32>
    %60 = arith.truncf %59 : vector<2x8x24xf32> to vector<2x8x24xbf16>
    %61 = arith.truncf %46 : vector<2x24x32xf32> to vector<2x24x32xbf16>
    "tpu.trace_start"() <{level = 10 : i32, message = "bqk,bkd->bqd"}> : () -> ()
    %cst_43 = arith.constant dense<0.000000e+00> : vector<2x8x32xf32>
    %62 = tpu.matmul %60, %61, %cst_43 {dimension_numbers = #tpu.dot_dimension_numbers<[2], [1], [1], [2], [0, 0, 0, 1, 1, 2], [0], [0]>} : vector<2x8x24xbf16>, vector<2x24x32xbf16>, vector<2x8x32xf32> -> vector<2x8x32xf32>
    "tpu.trace_stop"() : () -> ()
    %63 = vector.shape_cast %62 : vector<2x8x32xf32> to vector<16x32xf32>
    %64 = arith.truncf %63 : vector<16x32xf32> to vector<16x32xbf16>
    %c0_44 = arith.constant 0 : index
    %c0_45 = arith.constant 0 : index
    %65 = vector.load %arg11[%c0_44, %c0_45] : memref<32x32xbf16, #tpu.memory_space<vmem>>, vector<32x32xbf16>
    %cst_46 = arith.constant dense<0.000000e+00> : vector<16x32xf32>
    %66 = tpu.matmul %64, %65, %cst_46 {dimension_numbers = #tpu.dot_dimension_numbers<[1], [0], [0], [1], [0, 0, 1, 1], [], []>} : vector<16x32xbf16>, vector<32x32xbf16>, vector<16x32xf32> -> vector<16x32xf32>
    %67 = arith.addf %24, %66 : vector<16x32xf32>
    %68 = arith.truncf %67 : vector<16x32xf32> to vector<16x32xbf16>
    %c0_47 = arith.constant 0 : index
    %c0_48 = arith.constant 0 : index
    %69 = vector.load %arg12[%c0_47, %c0_48] : memref<32x64xbf16, #tpu.memory_space<vmem>>, vector<32x64xbf16>
    %cst_49 = arith.constant dense<0.000000e+00> : vector<16x64xf32>
    %70 = tpu.matmul %68, %69, %cst_49 {dimension_numbers = #tpu.dot_dimension_numbers<[1], [0], [0], [1], [0, 0, 1, 1], [], []>} : vector<16x32xbf16>, vector<32x64xbf16>, vector<16x64xf32> -> vector<16x64xf32>
    %c0_50 = arith.constant 0 : index
    %c0_51 = arith.constant 0 : index
    %71 = vector.load %arg13[%c0_50, %c0_51] : memref<1x64xf32, #tpu.memory_space<vmem>>, vector<1x64xf32>
    %72 = vector.broadcast %71 : vector<1x64xf32> to vector<16x64xf32>
    %73 = arith.addf %70, %72 : vector<16x64xf32>
    %74 = arith.mulf %73, %73 : vector<16x64xf32>
    %75 = arith.mulf %73, %74 : vector<16x64xf32>
    %cst_52 = arith.constant 4.471500e-02 : f32
    %76 = vector.broadcast %cst_52 : f32 to vector<16x64xf32>
    %77 = arith.mulf %76, %75 : vector<16x64xf32>
    %78 = arith.addf %73, %77 : vector<16x64xf32>
    %cst_53 = arith.constant 0.797884583 : f32
    %79 = vector.broadcast %cst_53 : f32 to vector<16x64xf32>
    %80 = arith.mulf %79, %78 : vector<16x64xf32>
    %81 = math.tanh %80 : vector<16x64xf32>
    %cst_54 = arith.constant 1.000000e+00 : f32
    %82 = vector.broadcast %cst_54 : f32 to vector<16x64xf32>
    %83 = arith.addf %82, %81 : vector<16x64xf32>
    %cst_55 = arith.constant 5.000000e-01 : f32
    %84 = vector.broadcast %cst_55 : f32 to vector<16x64xf32>
    %85 = arith.mulf %84, %83 : vector<16x64xf32>
    %86 = arith.mulf %73, %85 : vector<16x64xf32>
    %87 = arith.truncf %86 : vector<16x64xf32> to vector<16x64xbf16>
    %c0_56 = arith.constant 0 : index
    %c0_57 = arith.constant 0 : index
    %88 = vector.load %arg14[%c0_56, %c0_57] : memref<64x32xbf16, #tpu.memory_space<vmem>>, vector<64x32xbf16>
    %cst_58 = arith.constant dense<0.000000e+00> : vector<16x32xf32>
    %89 = tpu.matmul %87, %88, %cst_58 {dimension_numbers = #tpu.dot_dimension_numbers<[1], [0], [0], [1], [0, 0, 1, 1], [], []>} : vector<16x64xbf16>, vector<64x32xbf16>, vector<16x32xf32> -> vector<16x32xf32>
    %90 = arith.addf %67, %89 : vector<16x32xf32>
    %c0_59 = arith.constant 0 : index
    %c0_60 = arith.constant 0 : index
    %91 = vector.load %arg15[%c0_59, %c0_60] : memref<1x32xf32, #tpu.memory_space<vmem>>, vector<1x32xf32>
    %92 = vector.broadcast %91 : vector<1x32xf32> to vector<16x32xf32>
    %93 = arith.addf %90, %92 : vector<16x32xf32>
    %94 = arith.truncf %93 : vector<16x32xf32> to vector<16x32xbf16>
    %c0_61 = arith.constant 0 : index
    %c0_62 = arith.constant 0 : index
    %95 = vector.load %arg16[%c0_61, %c0_62] : memref<32x32xbf16, #tpu.memory_space<vmem>>, vector<32x32xbf16>
    %cst_63 = arith.constant dense<0.000000e+00> : vector<16x32xf32>
    %96 = tpu.matmul %94, %95, %cst_63 {dimension_numbers = #tpu.dot_dimension_numbers<[1], [0], [0], [1], [0, 0, 1, 1], [], []>} : vector<16x32xbf16>, vector<32x32xbf16>, vector<16x32xf32> -> vector<16x32xf32>
    %c0_64 = arith.constant 0 : index
    %c0_65 = arith.constant 0 : index
    %c0_66 = arith.constant 0 : index
    %97 = vector.load %arg17[%c0_64, %c0_65, %c0_66] : memref<1x16x32xf32, #tpu.memory_space<vmem>>, vector<1x16x32xf32>
    %98 = vector.shape_cast %97 : vector<1x16x32xf32> to vector<16x32xf32>
    %99 = vector.shape_cast %96 : vector<16x32xf32> to vector<1x16x32xf32>
    tpu.vector_store %arg17[%c0_64, %c0_65, %c0_66], %99 {strides = array<i32>} : memref<1x16x32xf32, #tpu.memory_space<vmem>>, vector<1x16x32xf32>,
    return
  }
  func.func @transform_0(%arg0: i32) -> (i32, i32, i32, i32) {
    %c0_i32 = arith.constant 0 : i32
    %c0_i32_0 = arith.constant 0 : i32
    %c0_i32_1 = arith.constant 0 : i32
    %c0_i32_2 = arith.constant 0 : i32
    return %arg0, %c0_i32, %c0_i32_0, %c0_i32_1 : i32, i32, i32, i32
  }
  func.func @transform_1(%arg0: i32) -> (i32, i32, i32, i32) {
    %c0_i32 = arith.constant 0 : i32
    %c0_i32_0 = arith.constant 0 : i32
    %c0_i32_1 = arith.constant 0 : i32
    %c0_i32_2 = arith.constant 0 : i32
    return %arg0, %c0_i32, %c0_i32_0, %c0_i32_1 : i32, i32, i32, i32
  }
  func.func @transform_2(%arg0: i32) -> (i32, i32, i32, i32) {
    %c0_i32 = arith.constant 0 : i32
    %c0_i32_0 = arith.constant 0 : i32
    %c0_i32_1 = arith.constant 0 : i32
    %c0_i32_2 = arith.constant 0 : i32
    return %arg0, %c0_i32, %c0_i32_0, %c0_i32_1 : i32, i32, i32, i32
  }
  func.func @transform_3(%arg0: i32) -> (i32, i32, i32) {
    %c0_i32 = arith.constant 0 : i32
    %c0_i32_0 = arith.constant 0 : i32
    %c0_i32_1 = arith.constant 0 : i32
    return %arg0, %c0_i32, %c0_i32_0 : i32, i32, i32
  }
  func.func @transform_4(%arg0: i32) -> (i32, i32, i32) {
    %c0_i32 = arith.constant 0 : i32
    %c0_i32_0 = arith.constant 0 : i32
    %c0_i32_1 = arith.constant 0 : i32
    return %arg0, %c0_i32, %c0_i32_0 : i32, i32, i32
  }
  func.func @transform_5(%arg0: i32) -> (i32, i32) {
    %c0_i32 = arith.constant 0 : i32
    %c0_i32_0 = arith.constant 0 : i32
    %c0_i32_1 = arith.constant 0 : i32
    return %c0_i32, %c0_i32_0 : i32, i32
  }
  func.func @transform_6(%arg0: i32) -> (i32, i32, i32) {
    %c0_i32 = arith.constant 0 : i32
    %c0_i32_0 = arith.constant 0 : i32
    %c0_i32_1 = arith.constant 0 : i32
    return %arg0, %c0_i32, %c0_i32_0 : i32, i32, i32
  }
  func.func @transform_7(%arg0: i32) -> (i32, i32) {
    %c0_i32 = arith.constant 0 : i32
    %c0_i32_0 = arith.constant 0 : i32
    %c0_i32_1 = arith.constant 0 : i32
    return %c0_i32, %c0_i32_0 : i32, i32
  }
  func.func @transform_8(%arg0: i32) -> (i32, i32) {
    %c0_i32 = arith.constant 0 : i32
    %c0_i32_0 = arith.constant 0 : i32
    %c0_i32_1 = arith.constant 0 : i32
    return %c0_i32, %c0_i32_0 : i32, i32
  }
  func.func @transform_9(%arg0: i32) -> (i32, i32) {
    %c0_i32 = arith.constant 0 : i32
    %c0_i32_0 = arith.constant 0 : i32
    %c0_i32_1 = arith.constant 0 : i32
    return %c0_i32, %c0_i32_0 : i32, i32
  }
  func.func @transform_10(%arg0: i32) -> (i32, i32) {
    %c0_i32 = arith.constant 0 : i32
    %c0_i32_0 = arith.constant 0 : i32
    %c0_i32_1 = arith.constant 0 : i32
    return %c0_i32, %c0_i32_0 : i32, i32
  }
  func.func @transform_11(%arg0: i32) -> (i32, i32) {
    %c0_i32 = arith.constant 0 : i32
    %c0_i32_0 = arith.constant 0 : i32
    %c0_i32_1 = arith.constant 0 : i32
    return %c0_i32, %c0_i32_0 : i32, i32
  }
  func.func @transform_12(%arg0: i32) -> (i32, i32) {
    %c0_i32 = arith.constant 0 : i32
    %c0_i32_0 = arith.constant 0 : i32
    %c0_i32_1 = arith.constant 0 : i32
    return %c0_i32, %c0_i32_0 : i32, i32
  }
  func.func @transform_13(%arg0: i32) -> (i32, i32) {
    %c0_i32 = arith.constant 0 : i32
    %c0_i32_0 = arith.constant 0 : i32
    %c0_i32_1 = arith.constant 0 : i32
    return %c0_i32, %c0_i32_0 : i32, i32
  }
  func.func @transform_14(%arg0: i32) -> (i32, i32) {
    %c0_i32 = arith.constant 0 : i32
    %c0_i32_0 = arith.constant 0 : i32
    %c0_i32_1 = arith.constant 0 : i32
    return %c0_i32, %c0_i32_0 : i32, i32
  }
  func.func @transform_15(%arg0: i32) -> (i32, i32) {
    %c0_i32 = arith.constant 0 : i32
    %c0_i32_0 = arith.constant 0 : i32
    %c0_i32_1 = arith.constant 0 : i32
    return %c0_i32, %c0_i32_0 : i32, i32
  }
  func.func @transform_16(%arg0: i32) -> (i32, i32, i32) {
    %c0_i32 = arith.constant 0 : i32
    %c0_i32_0 = arith.constant 0 : i32
    %c0_i32_1 = arith.constant 0 : i32
    return %arg0, %c0_i32, %c0_i32_0 : i32, i32, i32
  }
}

</mosaic_0001>

<bundles_post_ra>
// kernel: multimask_backbone_forward.1
= control target key start
LH: loop header
LB: loop body
LE: loop exit
PB: predicated region body
PF: predicated region fallthrough
CT: control target
= control target key end

     0   :  { %s2054_s0 = inlined_call_operand.vmem [shape: f32[2,2,16,32], index: 0, kind: input, shape index: {}]   ;;  %s2055_s1 = inlined_call_operand.vmem [shape: f32[2,2,8,32], index: 1, kind: input, shape index: {}]   ;;  %s2056_s2 = inlined_call_operand.vmem [shape: f32[2,2,8,32], index: 2, kind: input, shape index: {}]   ;;  %s2057_s3 = inlined_call_operand.vmem [shape: s32[2,32,1], index: 3, kind: input, shape index: {}]   ;;  %s2058_s4 = inlined_call_operand.vmem [shape: s32[2,16,1], index: 4, kind: input, shape index: {}]   ;;  %s2059_s5 = inlined_call_operand.vmem [shape: f32[64,32], index: 5, kind: input, shape index: {}]   ;;  %s2060_s6 = inlined_call_operand.vmem [shape: f32[2,1,32], index: 6, kind: input, shape index: {}]   ;;  %s2061_s7 = inlined_call_operand.vmem [shape: bf16[32,32], index: 7, kind: input, shape index: {}]   ;;  %s2062_s8 = inlined_call_operand.vmem [shape: bf16[32,32], index: 8, kind: input, shape index: {}]   ;;  %s2063_s9 = inlined_call_operand.vmem [shape: bf16[32,32], index: 9, kind: input, shape index: {}]   ;;  %s2064_s10 = inlined_call_operand.vmem [shape: bf16[32,32], index: 10, kind: input, shape index: {}]   ;;  %s2065_s11 = inlined_call_operand.vmem [shape: bf16[32,64], index: 11, kind: input, shape index: {}]   ;;  %s2066_s12 = inlined_call_operand.vmem [shape: f32[1,64], index: 12, kind: input, shape index: {}]   ;;  %s2067_s13 = inlined_call_operand.vmem [shape: bf16[64,32], index: 13, kind: input, shape index: {}]   ;;  %s2068_s14 = inlined_call_operand.vmem [shape: f32[1,32], index: 14, kind: input, shape index: {}]   ;;  %s2069_s15 = inlined_call_operand.hbm [shape: bf16[32,32], index: 15, kind: input, shape index: {}]   ;;  %s2070_s16 = inlined_call_operand.hbm [shape: f32[2,16,32], index: 16, kind: output, shape index: {}]  }
   0x1   :  { %2077 = sst [smem:[#allocation14_spill]] %s2054_s0 }
   0x2   :  { %2078 = sst [smem:[#allocation15_spill]] %s2055_s1 }
   0x3   :  { %2079 = sst [smem:[#allocation16_spill]] %s2069_s15 }
   0x4   :  { %21 = vsyncpa [#allocation4], 0 }
   0x5   :  { %22 = vsyncpa [#allocation5], 0 }
   0x6   :  { %24 = vsyncpa [#allocation5 + $0x1], 0  ;;  %s1802_s21 = smov 0   ;;  %s1804_s22 = smov 0  }
   0x7   :  { %s1806_s23 = smov 0   ;;  %s1808_s24 = smov 0  }
   0x8 LB: > { %2080 = sst [smem:[#allocation9_spill]] %s1696_s21  ;;  %s1823_s25 = sadd.s32 4294967295, %s1708_s24   ;;  %s1708_s24 = sphi %s1808_s24, %s2094_s24   ;;  %s1704_s23 = sphi %s1806_s23, %s2096_s23   ;;  %s1700_s22 = sphi %s1804_s22, %s2098_s22   ;;  %s1696_s21 = sphi %s1802_s21, %s2097_s21  }
   0x9   : > { %2081 = sst [smem:[#allocation10_spill]] %s1704_s23  ;;  %s1403_s26 = sadd.s32 4294967294, %s1708_s24  }
   0xa   : > { %s1827_s27 = sadd.s32 1, %s1708_s24   ;;  %s403_s28 = sadd.s32 1, %s1704_s23 }
   0xb   : > { %2082 = sst [smem:[#allocation11_spill]] %s1827_s27  ;;  %s400_s29 = ssub.s32 %s1708_s24, %s1827_s27 }
   0xc   : > { %p413_p0 = scmp.ne.s32.totalorder %s1704_s23, %s1700_s22  ;;  %p401_p1 = scmp.eq.s32.totalorder %s400_s29, 0 }
   0xd   : > { %p414_p2 = scmp.eq.s32.totalorder %s1823_s25, 1  ;;  %p419_p3 = scmp.ne.s32.totalorder %s1700_s22, %s1696_s21 }
   0xe   : > { %p420_p4 = scmp.eq.s32.totalorder %s1403_s26, 1  ;;  %p1404_p7 = scmp.ge.s32.totalorder %s1708_s24, 1 }
   0xf   : > { %s1838_s30 = scalar_select %p401_p1, %s1704_s23, %s403_s28  }
  0x10   : > { %p1840_p5 = por %p414_p2, %p413_p0  ;;  %p1844_p6 = por %p420_p4, %p419_p3 }
  0x11   : > { %2083 = sst [smem:[#allocation12_spill]] %s1838_s30  ;;  %p427_p8 = scmp.lt.s32.totalorder %s1708_s24, 3 }
  0x12   : > { %s2085_s17 = scalar_select %p1844_p6, 1, 0 }
  0x13   : > { %p1552_p9 = scmp.eq.s32.totalorder %s1823_s25, 0  ;;  %p428_p10 = pnand %p1404_p7, %p427_p8 }
  0x14   : > { %2086 = sst [smem:[#allocation13_spill]] %s2085_s17  ;;  %s1710_s26 = smov [#allocation3]  }
  0x15   : > { %s2087_s15 = sld [smem:[#allocation16_spill]]  ;;  %p1544_p11 = pneg %p428_p10 }
  0x16   : > { %s467_s28 = sshll.u32 %s1710_s26, 4  ;;  %s1711_s29 = smov 64   ;;  %s468_s28 = int_to_ptr.vmem [resolvable:$true] %s467_s28 }
  0x17   : > { %p1545_p12 = pnand %p1552_p9, %p1544_p11  ;;  %s1712_s30 = smov 4  }
  0x18   : > { %529 = sbr.rel (%p428_p10) target bundleno = 1601 (0x641), region = 84 }
  0x1b   : > { %s465_s20 = sshll.u32 %s2087_s15, 4  ;;  %s466_s20 = int_to_ptr.hbm [resolvable:$true] %s465_s20 }
  0x1c   : > { %1547 = dma.hbm_to_vmem [thread:$0]  (!%p1545_p12), %s466_s20, 256, %s468_s28, [#allocation4], %s1711_s29, %s1711_s29, %s1712_s30  }
  0x1d   : > { %1687 = dma.done.wait (%p1552_p9), [#allocation4], 256  }
  0x1e   : > { %1689 = vsyncadd (%p1552_p9), [#allocation4], 4294967040  ;;  %p603_p13 = scmp.lt.s32.totalorder %s1823_s25, 1  ;;  %v1713_v0 = vmov 0   ;;  %s2088_s1 = sld [smem:[#allocation15_spill]]  ;;  %vm773_vm0 = vcmask 261120   ;;  %v644_v17 = vlaneseq }
  0x1f   : > { %1594 = vset.pattern.permute.xlu0 %v1713_v0  ;;  %1596 = vset.pattern.permute.xlu2 %v1713_v0  ;;  %v639_v6 = vld [vmem:[%s2059_s5 + $0x38] sm:$0xff]  ;;  %v638_v7 = vld [vmem:[%s2059_s5 + $0x30] sm:$0xff]  ;;  %v637_v8 = vld [vmem:[%s2059_s5 + $0x28] sm:$0xff]  ;;  %vm670_vm1 = vcmask 523264   ;;  %v1714_v20 = vmov 0.0   ;;  %vm1025_vm8 = vcmask 1043456  }
  0x20   : > { %s1862_s18 = scalar_select %p603_p13, %s1823_s25, 1  ;;  %1595 = vset.pattern.permute.xlu1 %v1713_v0  ;;  %740 = vmatpush.msra.mxu1 %v639_v6  ;;  %v636_v12 = vld [vmem:[%s2059_s5 + $0x20] sm:$0xff]  ;;  %v635_v13 = vld [vmem:[%s2059_s5 + $0x18] sm:$0xff]  ;;  %v634_v14 = vld [vmem:[%s2059_s5 + $0x10] sm:$0xff]  ;;  %v645_v18 = vand.u32 127, %v644_v17  ;;  %vm982_vm9 = vcmask 195584  }
  0x21   : > { %691 = vmatpush.msra.mxu0 %v639_v6  ;;  %v633_v15 = vld [vmem:[%s2059_s5 + $0x8] sm:$0xff]  ;;  %v632_v16 = vld [vmem:[%s2059_s5] sm:$0xff]  ;;  %s1537_s29 = sshll.u32 %s1823_s25, 4 }
  0x22   : > { %s2076_s30 = sshll.u32 %s1862_s18, 5  ;;  %s1866_s19 = sshll.u32 %s1862_s18, 4  ;;  %741 = vmatpush.msra.mxu1 %v638_v7  ;;  %v1522_v32 = vld [vmem:[%s2061_s7 + $0x8] sm:$0xff]  ;;  %v1521_v33 = vld [vmem:[%s2061_s7] sm:$0xff] }
  0x23   : > { %s622_s28 = scalar_lea.vmem %s2057_s3, %s2076_s30  ;;  %s627_s21 = scalar_lea.vmem %s2058_s4, %s1866_s19  ;;  %692 = vmatpush.msra.mxu0 %v638_v7  ;;  %814 = vmatpush.bf16.msra.mxu2 %v1522_v32  ;;  %v1524_v36 = vld [vmem:[%s2062_s8 + $0x8] sm:$0xff]  ;;  %v1523_v42 = vld [vmem:[%s2062_s8] sm:$0xff] }
  0x24   : > { %s612_s23 = scalar_lea.vmem %s2088_s1, %s1866_s19  ;;  %v640_v1 = vld [vmem:[%s622_s28] sm:$0xff]  ;;  %v642_v5 = vld [vmem:[%s622_s28 + $0x10] sm:$0xff]  ;;  %v641_v9 = vld [vmem:[%s622_s28 + $0x8] sm:$0xff]  ;;  %742 = vmatpush.msra.mxu1 %v637_v8  ;;  %s617_s26 = scalar_lea.vmem %s2056_s2, %s1866_s19  ;;  %856 = vmatpush.bf16.msra.mxu3 %v1524_v36 }
  0x25   : > { %v712_v2 = vld [vmem:[%s627_s21] sm:$0xff]  ;;  %647 = vperm.xlu0 %1594, %v640_v1   ;;  %v779_v4 = vld [vmem:[%s612_s23 + $0x8] sm:$0xff]  ;;  %653 = vperm.xlu1 %1595, %v642_v5   ;;  %v643_v11 = vld [vmem:[%s622_s28 + $0x18] sm:$0xff]  ;;  %s2090_s1 = sshll.u32 %s1862_s18, 5 }
  0x26   : > { %v778_v3 = vld [vmem:[%s612_s23] sm:$0xff]  ;;  %715 = vperm.xlu2 %1596, %v712_v2   ;;  %781 = vst.msk [vmem:[#allocation2 + $0x28] sm:$0xff] %vm773_vm0, %v779_v4  ;;  %v713_v10 = vld [vmem:[%s627_s21 + $0x8] sm:$0xff]  ;;  %693 = vmatpush.msra.mxu0 %v637_v8  ;;  %s2089_s21 = scalar_lea.vmem %s2060_s6, %s1862_s18  ;;  %s600_s23 = sand.u32 1, %s1700_s22  }
  0x27   : > { %780 = vst.msk [vmem:[#allocation2 + $0x10] sm:$0xff] %vm773_vm0, %v778_v3  ;;  %743 = vmatpush.msra.mxu1 %v636_v12  ;;  %815 = vmatpush.bf16.msra.mxu2 %v1521_v33  ;;  %v755_v35 = vld [vmem:[%s617_s26] sm:$0xff]  ;;  %v1526_v37 = vld [vmem:[%s2063_s9 + $0x8] sm:$0xff] }
  0x28   : > { %694 = vmatpush.msra.mxu0 %v636_v12  ;;  %v1597_v39 = vld [vmem:[%s2089_s21] ss:$0 sm:$0xff]  ;;  %v756_v40 = vld [vmem:[%s617_s26 + $0x8] sm:$0xff]  ;;  %857 = vmatpush.bf16.msra.mxu3 %v1523_v42  ;;  %s2091_s26 = sld [smem:[#allocation14_spill]]  ;;  %s1257_s21 = scalar_lea.sflag [#allocation5], %s600_s23 }
  0x29   : > { %744 = vmatpush.msra.mxu1 %v635_v13  ;;  %v1525_v43 = vld [vmem:[%s2063_s9] sm:$0xff] }
  0x2a   : > { %695 = vmatpush.msra.mxu0 %v635_v13 }
  0x2b   : > { %745 = vmatpush.msra.mxu1 %v634_v14  ;;  %896 = vmatpush.bf16.msrb.mxu2 %v1526_v37 }
  0x2c   : > { %696 = vmatpush.msra.mxu0 %v634_v14 }
  0x2d   : > { %650 = vperm.xlu0 %1594, %v641_v9   ;;  %656 = vperm.xlu1 %1595, %v643_v11   ;;  %v787_v3 = vld [vmem:[#allocation2 + $0x28] sm:$0xff] }
  0x2e   : > { %718 = vperm.xlu2 %1596, %v713_v10   ;;  %746 = vmatpush.msra.mxu1 %v633_v15  ;;  %s607_s15 = scalar_lea.vmem %s2091_s26, %s2090_s1  ;;  %v784_v63 = vld [vmem:[#allocation2 + $0x10] sm:$0xff]  ;;  %s1409_s1 = sshll.u32 %s600_s23, 4 }
  0x2f   : > { %697 = vmatpush.msra.mxu0 %v633_v15  ;;  %897 = vmatpush.bf16.msrb.mxu2 %v1525_v43  ;;  %v765_v48 = vld [vmem:[%s607_s15] sm:$0xff]  ;;  %v766_v51 = vld [vmem:[%s607_s15 + $0x8] sm:$0xff]  ;;  %v767_v54 = vld [vmem:[%s607_s15 + $0x10] sm:$0xff]  ;;  %s602_s18 = scalar_lea.vmem [#allocation6], %s1409_s1  ;;  %s1662_s1 = scalar_lea.hbm %s2070_s16, 32 }
  0x30   : > { %747 = vmatpush.msra.mxu1 %v632_v16  ;;  %v768_v60 = vld [vmem:[%s607_s15 + $0x18] sm:$0xff]  ;;  %s1268_s15 = scalar_lea.hbm %s2070_s16, %s1537_s29  ;;  %s1269_s27 = sshll.u32 %s602_s18, 4  ;;  %s1270_s27 = int_to_ptr.vmem [resolvable:$true] %s1269_s27 }
  0x31   : > { %698 = vmatpush.msra.mxu0 %v632_v16  ;;  %s1271_s17 = sshll.u32 %s1268_s15, 4  ;;  %s1272_s17 = int_to_ptr.hbm [resolvable:$true] %s1271_s17 }
  0x32   : > { %s1656_s19 = sshra.s32 %s1272_s17, 4  ;;  %s1657_s19 = int_to_ptr.hbm [resolvable:$true] %s1656_s19 }
  0x33   : > { %s1658_s25 = scalar_lea.hbm %s1657_s19, 16  ;;  %p1663_p3 = scmp.lt.s32.totalorder %s1657_s19, %s2070_s16 }
  0x34   : > { %p1659_p0 = scmp.ne.s32.totalorder %s1657_s19, %s1658_s25  ;;  %p1664_p4 = scmp.lt.s32.totalorder %s1662_s1, %s1658_s25 }
  0x36   : > { %p1660_p1 = pnand %p1659_p0, %p1840_p5  ;;  %p1665_p7 = por %p1664_p4, %p1663_p3 }
  0x38   : > { %p1661_p2 = pneg %p1660_p1 }
  0x3a   : > { %p1666_p8 = pnand %p1665_p7, %p1661_p2 }
  0x80   : > { %v716_v19 = vpop.permute.xlu2 %715 }
  0x81   : > { %vm720_vm2 = vcmp.eq.s32.totalorder %v645_v18, %v716_v19 }
  0x82   : > { %v1428_v21 = vsel %vm720_vm2, 1.0, %v1714_v20 }
  0x83   : > { %1430 = vmatmul.msk.f32.vlgmr.msra.gmra.mxu1 %vm670_vm1, %v1428_v21 }
  0x88   : > { %v719_v22 = vpop.permute.xlu2 %718 }
  0x89   : > { %vm721_vm3 = vcmp.eq.s32.totalorder %v645_v18, %v719_v22 }
  0x8a   : > { %v1429_v23 = vsel %vm721_vm3, 1.0, %v1714_v20 }
  0x8b   : > { %1431 = vmatmul.msk.f32.gmra.mxu1 %vm670_vm1, %v1429_v23 }
  0x97   : > { %v648_v24 = vpop.permute.xlu0 %647  ;;  %v654_v27 = vpop.permute.xlu1 %653 }
  0x98   : > { %vm658_vm4 = vcmp.eq.s32.totalorder %v645_v18, %v648_v24  ;;  %vm660_vm6 = vcmp.eq.s32.totalorder %v645_v18, %v654_v27 }
  0x99   : > { %v1420_v25 = vsel %vm658_vm4, 1.0, %v1714_v20  ;;  %v1422_v29 = vsel %vm660_vm6, 1.0, %v1714_v20 }
  0x9a   : > { %1424 = vmatmul.msk.f32.vlgmr.msra.gmra.mxu0 %vm670_vm1, %v1420_v25 }
  0x9f   : > { %v651_v26 = vpop.permute.xlu0 %650  ;;  %v657_v30 = vpop.permute.xlu1 %656 }
  0xa0   : > { %vm659_vm5 = vcmp.eq.s32.totalorder %v645_v18, %v651_v26  ;;  %vm661_vm7 = vcmp.eq.s32.totalorder %v645_v18, %v657_v30 }
  0xa1   : > { %v1421_v28 = vsel %vm659_vm5, 1.0, %v1714_v20  ;;  %v1423_v31 = vsel %vm661_vm7, 1.0, %v1714_v20 }
  0xa2   : > { %1425 = vmatmul.msk.f32.gmra.mxu0 %vm670_vm1, %v1421_v28 }
  0xaa   : > { %1426 = vmatmul.msk.f32.gmra.mxu0 %vm670_vm1, %v1422_v29 }
  0xb2   : > { %1427 = vmatmul.msk.f32.gmra.mxu0 %vm670_vm1, %v1423_v31 }
 0x100   : > { %v749_v34 = vpop.f32.mrf.mxu1 }
 0x101   : > { %v757_v38 = vadd.f32 %v755_v35, %v749_v34 }
 0x103   : > { %v1944_v44 = vadd.f32 %v1597_v39, %v757_v38 }
 0x108   : > { %v752_v41 = vpop.f32.mrf.mxu1 }
 0x109   : > { %v758_v45 = vadd.f32 %v756_v40, %v752_v41 }
 0x10b   : > { %v1946_v46 = vadd.f32 %v1597_v39, %v758_v45 }
 0x10d   : > { %v788_v47 = vpack.c.bf16 %v1946_v46, %v1944_v44 }
 0x10f   : > { %1440 = vmatmul.msk.bf16.vlgmr.msra.gmra.mxu2 %vm773_vm0, %v788_v47 }
 0x117   : > { %v700_v49 = vpop.f32.mrf.mxu0 }
 0x118   : > { %v769_v50 = vadd.f32 %v765_v48, %v700_v49 }
 0x11a   : > { %774 = vst.msk [vmem:[#allocation2] sm:$0xff] %vm773_vm0, %v769_v50 }
 0x11f   : > { %v703_v52 = vpop.f32.mrf.mxu0 }
 0x120   : > { %v770_v53 = vadd.f32 %v766_v51, %v703_v52 }
 0x121   : > { %v782_v57 = vld [vmem:[#allocation2] sm:$0xff] }
 0x122   : > { %775 = vst.msk [vmem:[#allocation2 + $0x8] sm:$0xff] %vm773_vm0, %v770_v53 }
 0x127   : > { %v706_v55 = vpop.f32.mrf.mxu0 }
 0x128   : > { %v771_v56 = vadd.f32 %v767_v54, %v706_v55 }
 0x129   : > { %v783_v58 = vld [vmem:[#allocation2 + $0x8] sm:$0xff] }
 0x12a   : > { %776 = vst.msk [vmem:[#allocation2 + $0x18] sm:$0xff] %vm773_vm0, %v771_v56  ;;  %v822_v59 = vpack.c.bf16 %v783_v58, %v782_v57 }
 0x12c   : > { %1449 = vmatmul.msk.bf16.vlgmr.msra.gmra.mxu3 %vm773_vm0, %v822_v59  ;;  %1460 = vmatmul.msk.bf16.vlgmr.msrb.gmra.mxu2 %vm773_vm0, %v822_v59 }
 0x12f   : > { %v709_v61 = vpop.f32.mrf.mxu0 }
 0x130   : > { %v772_v62 = vadd.f32 %v768_v60, %v709_v61 }
 0x131   : > { %v785_v0 = vld [vmem:[#allocation2 + $0x18] sm:$0xff] }
 0x132   : > { %777 = vst.msk [vmem:[#allocation2 + $0x20] sm:$0xff] %vm773_vm0, %v772_v62  ;;  %v823_v1 = vpack.c.bf16 %v785_v0, %v784_v63 }
 0x139   : > { %v786_v2 = vld [vmem:[#allocation2 + $0x20] sm:$0xff] }
 0x13a   : > { %v824_v4 = vpack.c.bf16 %v787_v3, %v786_v2 }
 0x13c   : > { %1450 = vmatmul.msk.bf16.gmra.mxu3 %vm773_vm0, %v823_v1  ;;  %1461 = vmatmul.msk.bf16.gmra.mxu2 %vm773_vm0, %v823_v1 }
 0x14c   : > { %1451 = vmatmul.msk.bf16.gmra.mxu3 %vm773_vm0, %v824_v4  ;;  %1462 = vmatmul.msk.bf16.gmra.mxu2 %vm773_vm0, %v824_v4 }
 0x192   : > { %v817_v5 = vpop.f32.mrf.mxu2 }
 0x193   : > { %v914_v35 = vpack.c.bf16 %v817_v5, %v817_v5 }
 0x19a   : > { %v1966_v6 = vpop.f32.mrf.mxu2 }
 0x19b   : > { %v915_v60 = vpack.c.bf16 %v1966_v6, %v1966_v6 }
 0x1af   : > { %v859_v7 = vpop.f32.mrf.mxu3  ;;  %v899_v8 = vpop.f32.mrf.mxu2 }
 0x1b0   : > { %v916_v17 = vpack.c.bf16 %v859_v7, %v859_v7  ;;  %v1007_v28 = vpack.c.bf16 %v899_v8, %v899_v8 }
 0x1b2   : > { %v925_v24 = vunpack.c.l.b16 %v916_v17  ;;  %v1016_v34 = vunpack.c.l.b16 %v1007_v28  ;;  %v1530_v28 = vld [vmem:[%s2065_s11 + $0x8] sm:$0xff] }
 0x1b7   : > { %v861_v9 = vpop.f32.mrf.mxu3  ;;  %v901_v10 = vpop.f32.mrf.mxu2 }
 0x1b8   : > { %v917_v14 = vpack.c.bf16 %v861_v9, %v861_v9  ;;  %v1008_v25 = vpack.c.bf16 %v901_v10, %v901_v10 }
 0x1ba   : > { %v926_v19 = vunpack.c.l.b16 %v917_v14  ;;  %v1017_v29 = vunpack.c.l.b16 %v1008_v25 }
 0x1bc   : > { %v928_v26 = vpack.c.b16 %v926_v19, %v925_v24  ;;  %v1019_v36 = vpack.c.b16 %v1017_v29, %v1016_v34  ;;  %v1529_v29 = vld [vmem:[%s2065_s11] sm:$0xff] }
 0x1be   : > { %v934_v30 = vsel %vm773_vm0, %v928_v26, 0 }
 0x1bf   : > { %v864_v11 = vpop.f32.mrf.mxu3  ;;  %v904_v12 = vpop.f32.mrf.mxu2 }
 0x1c0   : > { %v918_v13 = vpack.c.bf16 %v864_v11, %v864_v11  ;;  %v1009_v16 = vpack.c.bf16 %v904_v12, %v904_v12 }
 0x1c2   : > { %v927_v15 = vunpack.c.l.b16 %v918_v13  ;;  %v1018_v21 = vunpack.c.l.b16 %v1009_v16  ;;  %v1528_v13 = vld [vmem:[%s2064_s10 + $0x8] sm:$0xff] }
 0x1c4   : > { %v929_v18 = vpack.c.b16 %v927_v15, %v927_v15  ;;  %v1020_v27 = vpack.c.b16 %v1018_v21, %v1018_v21 }
 0x1c6   : > { %v937_v20 = vsel %vm773_vm0, %v929_v18, 0  ;;  %v1027_v33 = vsel %vm1025_vm8, %v1020_v27, 0 }
 0x1c7   : > { %v866_v22 = vpop.f32.mrf.mxu3  ;;  %v906_v23 = vpop.f32.mrf.mxu2  ;;  %945 = vmatpush.bf16.xpose.msrb.mxu1 %v937_v20 }
 0x1c8   : > { %v1010_v47 = vpack.c.bf16 %v906_v23, %v906_v23  ;;  %v919_v48 = vpack.c.bf16 %v866_v22, %v866_v22  ;;  %v1527_v22 = vld [vmem:[%s2064_s10] sm:$0xff] }
 0x1ca   : > { %v1045_v55 = vunpack.c.l.b16 %v1010_v47  ;;  %v955_v56 = vunpack.c.l.b16 %v919_v48 }
 0x1cf   : > { %v869_v31 = vpop.f32.mrf.mxu3  ;;  %v909_v32 = vpop.f32.mrf.mxu2  ;;  %946 = vmatpush.bf16.xpose.msrb.mxu1 %v934_v30 }
 0x1d0   : > { %v1011_v41 = vpack.c.bf16 %v909_v32, %v909_v32  ;;  %v920_v42 = vpack.c.bf16 %v869_v31, %v869_v31 }
 0x1d2   : > { %v1046_v51 = vunpack.c.l.b16 %v1011_v41  ;;  %v956_v52 = vunpack.c.l.b16 %v920_v42 }
 0x1d4   : > { %v1048_v57 = vpack.c.b16 %v1046_v51, %v1045_v55  ;;  %v958_v58 = vpack.c.b16 %v956_v52, %v955_v56 }
 0x1d6   : > { %1463 = vmatmul.msk.bf16.vlgmr.msrb.gmra.mxu1 %vm773_vm0, %v914_v35  ;;  %v964_v59 = vsel %vm773_vm0, %v958_v58, 0  ;;  %v1534_v35 = vld [vmem:[%s2067_s13 + $0x18] sm:$0xff] }
 0x1d7   : > { %1035 = vmatpush.bf16.msra.mxu1 %v1027_v33  ;;  %v871_v37 = vpop.f32.mrf.mxu3  ;;  %v911_v38 = vpop.f32.mrf.mxu2  ;;  %1202 = vmatpush.bf16.msra.mxu2 %v1534_v35 }
 0x1d8   : > { %v921_v39 = vpack.c.bf16 %v871_v37, %v871_v37  ;;  %v1012_v40 = vpack.c.bf16 %v911_v38, %v911_v38  ;;  %v1532_v37 = vld [vmem:[%s2067_s13 + $0x8] sm:$0xff] }
 0x1da   : > { %v957_v43 = vunpack.c.l.b16 %v921_v39  ;;  %v1047_v45 = vunpack.c.l.b16 %v1012_v40 }
 0x1db   : > { %1036 = vmatpush.bf16.msra.mxu1 %v1019_v36  ;;  %v1533_v36 = vld [vmem:[%s2067_s13 + $0x10] sm:$0xff] }
 0x1dc   : > { %v959_v49 = vpack.c.b16 %v957_v43, %v957_v43  ;;  %v1049_v50 = vpack.c.b16 %v1047_v45, %v1047_v45  ;;  %1203 = vmatpush.bf16.msra.mxu2 %v1533_v36 }
 0x1de   : > { %v967_v53 = vsel %vm773_vm0, %v959_v49, 0  ;;  %v1055_v54 = vsel %vm1025_vm8, %v1049_v50, 0 }
 0x1df   : > { %975 = vmatpush.bf16.xpose.msrb.mxu0 %v967_v53  ;;  %1063 = vmatpush.bf16.msrb.mxu3 %v1055_v54 }
 0x1e0   : > { %1136 = vmatpush.bf16.msrb.mxu1 %v1530_v28  ;;  %1204 = vmatpush.bf16.msra.mxu2 %v1532_v37 }
 0x1e3   : > { %1064 = vmatpush.bf16.msrb.mxu3 %v1048_v57 }
 0x1e4   : > { %1137 = vmatpush.bf16.msrb.mxu1 %v1529_v29 }
 0x1e7   : > { %976 = vmatpush.bf16.xpose.msrb.mxu0 %v964_v59 }
 0x1ee   : > { %1464 = vmatmul.msk.bf16.vlgmr.msrb.gmra.mxu0 %vm773_vm0, %v915_v60 }
 0x1ef   : > { %1096 = vmatpush.bf16.msra.mxu0 %v1528_v13 }
 0x1f3   : > { %1097 = vmatpush.bf16.msra.mxu0 %v1527_v22 }
 0x253   : > { %v948_v61 = vpop.f32.mrf.mxu1 }
 0x254   : > { %v983_v62 = vsel %vm982_vm9, %v948_v61, -inf }
 0x255   : > { %984 = vmax.xlane.f32.xlu1 %v983_v62 }
 0x25b   : > { %v950_v63 = vpop.f32.mrf.mxu1 }
 0x25c   : > { %v1536_v63 = vld [vmem:[#allocation3 + $0x8] sm:$0xff] }
 0x25d   : > { %1246 = vmatpush.bf16.msra.mxu3 %v1536_v63 }
 0x26b   : > { %v978_v0 = vpop.f32.mrf.mxu0 }
 0x26c   : > { %v986_v1 = vsel %vm982_vm9, %v978_v0, -inf }
 0x26d   : > { %987 = vmax.xlane.f32.xlu0 %v986_v1 }
 0x273   : > { %v980_v2 = vpop.f32.mrf.mxu0 }
 0x2c8   : > { %v985_v3 = vpop.xlane.xlu1 %984 }
 0x2c9   : > { %v989_v7 = vsub.f32 %v948_v61, %v985_v3  ;;  %v1599_v3 = vld [vmem:[%s2068_s14] ss:$0 sm:$0xff] }
 0x2cb   : > { %v991_v6 = vmul.f32 1.442695, %v989_v7 }
 0x2e0   : > { %v988_v4 = vpop.xlane.xlu0 %987 }
 0x2e1   : > { %v990_v5 = vsub.f32 %v978_v0, %v988_v4  ;;  %v1535_v0 = vld [vmem:[#allocation3] sm:$0xff] }
 0x2e2   : > { %1247 = vmatpush.bf16.msra.mxu3 %v1535_v0 }
 0x2e3   : > { %v993_v8 = vmul.f32 1.442695, %v990_v5 }
 0x2e5   : > { %1600 = vpow2.f32 %v993_v8 }
 0x2e6   : > { %1602 = vpow2.f32 %v991_v6 }
 0x2eb   : > { %v1601_v9 = vpop.eup %1600 }
 0x2ec   : > { %v998_v10 = vsel %vm982_vm9, %v1601_v9, 0.0  ;;  %v1603_v11 = vpop.eup %1602 }
 0x2ed   : > { %999 = vadd.xlane.f32.xlu2 %v998_v10  ;;  %v995_v12 = vsel %vm982_vm9, %v1603_v11, 0.0 }
 0x2f5   : > { %996 = vadd.xlane.f32.xlu2 %v995_v12 }
 0x360   : > { %v1000_v14 = vpop.xlane.xlu2 %999 }
 0x361   : > { %1604 = vrcp.f32 %v1000_v14 }
 0x367   : > { %v1605_v15 = vpop.eup %1604 }
 0x368   : > { %v1004_v16 = vmul.f32 %v1605_v15, %v1601_v9  ;;  %v997_v17 = vpop.xlane.xlu2 %996 }
 0x369   : > { %1606 = vrcp.f32 %v997_v17 }
 0x36a   : > { %v1006_v18 = vpack.c.bf16 %v1004_v16, %v1004_v16 }
 0x36c   : > { %1466 = vmatmul.msk.bf16.vlgmr.msrb.gmra.mxu3 %vm982_vm9, %v1006_v18 }
 0x36f   : > { %v1607_v19 = vpop.eup %1606 }
 0x370   : > { %v1003_v20 = vmul.f32 %v1607_v19, %v1603_v11 }
 0x372   : > { %v1005_v21 = vpack.c.bf16 %v1003_v20, %v1003_v20 }
 0x374   : > { %1465 = vmatmul.msk.bf16.vlgmr.msra.gmra.mxu1 %vm982_vm9, %v1005_v21 }
 0x3ef   : > { %v1066_v23 = vpop.f32.mrf.mxu3 }
 0x3f1   : > { %v1038_v24 = vpop.f32.mrf.mxu1 }
 0x3f2   : > { %v1070_v25 = vpack.c.bf16 %v1066_v23, %v1038_v24 }
 0x3f4   : > { %1475 = vmatmul.msk.bf16.vlgmr.msra.gmra.mxu0 %vm773_vm0, %v1070_v25 }
 0x3f7   : > { %v1068_v26 = vpop.f32.mrf.mxu3 }
 0x3f9   : > { %v1040_v27 = vpop.f32.mrf.mxu1 }
 0x471   : > { %v1099_v30 = vpop.f32.mrf.mxu0 }
 0x472   : > { %v1104_v32 = vadd.f32 %v1099_v30, %v1944_v44  ;;  %v1598_v44 = vld [vmem:[%s2066_s12] ss:$0 sm:$0xff] }
 0x479   : > { %v1101_v31 = vpop.f32.mrf.mxu0 }
 0x47a   : > { %v1105_v33 = vadd.f32 %v1101_v31, %v1946_v46  ;;  %v1531_v46 = vld [vmem:[%s2067_s13] sm:$0xff] }
 0x47b   : > { %1205 = vmatpush.bf16.msra.mxu2 %v1531_v46 }
 0x47c   : > { %v1106_v34 = vpack.c.bf16 %v1105_v33, %v1104_v32 }
 0x47e   : > { %1484 = vmatmul.msk.bf16.vlgmr.msrb.gmra.mxu1 %vm773_vm0, %v1106_v34 }
 0x4fb   : > { %v1139_v38 = vpop.f32.mrf.mxu1 }
 0x4fc   : > { %v1140_v39 = vadd.f32 %v1598_v44, %v1139_v38 }
 0x4fe   : > { %v1144_v40 = vmul.f32 %v1140_v39, %v1140_v39 }
 0x500   : > { %v1146_v41 = vmul.f32 %v1144_v40, %v1140_v39 }
 0x502   : > { %v1148_v42 = vmul.f32 0.044715, %v1146_v41 }
 0x503   : > { %v1141_v43 = vpop.f32.mrf.mxu1 }
 0x504   : > { %v1150_v45 = vadd.f32 %v1148_v42, %v1140_v39  ;;  %v1142_v47 = vadd.f32 %v1598_v44, %v1141_v43 }
 0x506   : > { %v1152_v48 = vmul.f32 0.7978846, %v1150_v45  ;;  %v1145_v49 = vmul.f32 %v1142_v47, %v1142_v47 }
 0x508   : > { %v1147_v50 = vmul.f32 %v1145_v49, %v1142_v47  ;;  %1608 = vtanh.f32 %v1152_v48 }
 0x50a   : > { %v1149_v51 = vmul.f32 0.044715, %v1147_v50 }
 0x50c   : > { %v1151_v52 = vadd.f32 %v1149_v51, %v1142_v47 }
 0x50e   : > { %v1153_v53 = vmul.f32 0.7978846, %v1151_v52  ;;  %v1609_v54 = vpop.eup %1608 }
 0x50f   : > { %v1156_v55 = vadd.f32 1.0, %v1609_v54 }
 0x510   : > { %1610 = vtanh.f32 %v1153_v53 }
 0x511   : > { %v1158_v57 = vmul.f32 0.5, %v1156_v55 }
 0x513   : > { %v1160_v60 = vmul.f32 %v1158_v57, %v1140_v39 }
 0x516   : > { %v1611_v56 = vpop.eup %1610 }
 0x517   : > { %v1157_v58 = vadd.f32 1.0, %v1611_v56 }
 0x519   : > { %v1159_v59 = vmul.f32 0.5, %v1157_v58 }
 0x51b   : > { %v1161_v61 = vmul.f32 %v1159_v59, %v1142_v47 }
 0x51d   : > { %v1162_v62 = vpack.c.bf16 %v1161_v61, %v1160_v60 }
 0x51f   : > { %1501 = vmatmul.msk.bf16.vlgmr.msra.gmra.mxu2 %vm670_vm1, %v1162_v62 }
 0x5a2   : > { %v1207_v1 = vpop.f32.mrf.mxu2 }
 0x5a3   : > { %v1212_v2 = vadd.f32 %v1207_v1, %v1104_v32 }
 0x5a5   : > { %v1218_v7 = vadd.f32 %v1599_v3, %v1212_v2 }
 0x5aa   : > { %v1209_v4 = vpop.f32.mrf.mxu2 }
 0x5ab   : > { %v1213_v5 = vadd.f32 %v1209_v4, %v1105_v33 }
 0x5ad   : > { %v1219_v8 = vadd.f32 %v1599_v3, %v1213_v5 }
 0x5af   : > { %v1220_v6 = vpack.c.bf16 %v1219_v8, %v1218_v7 }
 0x5b1   : > { %1510 = vmatmul.msk.bf16.vlgmr.msra.gmra.mxu3 %vm773_vm0, %v1220_v6 }
 0x634   : > { %v1249_v9 = vpop.f32.mrf.mxu3 }
 0x635   : > { %1254 = vst.msk [vmem:[%s602_s18] sm:$0xff] %vm773_vm0, %v1249_v9 }
 0x63c   : > { %v1251_v10 = vpop.f32.mrf.mxu3 }
 0x63d   : > { %1255 = vst.msk [vmem:[%s602_s18 + $0x8] sm:$0xff] %vm773_vm0, %v1251_v10 }
 0x63e   : > { %1669 = shalt.err (!%p1666_p8)
}
 0x63f   : > { %s1715_s23 = smov 128   ;;  %s1716_s26 = smov 8  }
 0x640   : > { %1542 = dma.vmem_to_hbm [thread:$0]  (%p1840_p5), %s1270_s27, 256, %s1272_s17, %s1257_s21, %s1715_s23, %s1715_s23, %s1716_s26  }
 0x641 PF: > { %s2092_s15 = sld [smem:[#allocation9_spill]]  ;;  %p1554_p9 = scmp.ge.s32.totalorder %s1708_s24, 2 }
 0x643   : > { %p1549_p10 = pnand %p1554_p9, %p1844_p6 }
 0x645   : > { %p1550_p11 = pneg %p1549_p10 }
 0x647   : > { %s1286_s28 = sand.u32 1, %s2092_s15  }
 0x648   : > { %s1287_s30 = scalar_lea.sflag [#allocation5], %s1286_s28 }
 0x649   : > { %1691 = dma.done.wait (%p1550_p11), %s1287_s30, 256  }
 0x64a   : > { %1693 = vsyncadd (%p1550_p11), %s1287_s30, 4294967040  ;;  %s2094_s24 = sld [smem:[#allocation11_spill]]  ;;  %s2097_s21 = smov %s1700_s22 }
 0x64b   : > { %s2095_s19 = sld [smem:[#allocation10_spill]] }
 0x64c   : > { %s2096_s23 = sld [smem:[#allocation12_spill]] }
 0x650   : > { %p27_p12 = scmp.ge.s32.totalorder %s2094_s24, 4  }
 0x651   : > { %s2098_s22 = smov %s2095_s19 }
 0x652   :  { %29 = sbr.rel (!%p27_p12) target bundleno = 8 (0x8), region = 139 }
 0x657   :  { %1293 = vsyncpa [#allocation4], 1 }
 0x658   :  { %1295 = vsyncpa [#allocation4 + $0x1], 1 }
 0x659   :  { %1296 = vsyncpa [#allocation5], 1 }
 0x65a   :  { %1298 = vsyncpa [#allocation5 + $0x1], 1 }

</bundles_post_ra>
